<compile_context>
chip_gen: v7x
topology: tpu7x:2x2x1
jax: 0.10.0
libtpu: 0.0.40
codegen_flags: <defaults>
</compile_context>

<pallas_src>
import functools

import jax
import jax.numpy as jnp
from jax.experimental import pallas as pl
from jax.experimental.pallas import tpu as pltpu

_LANE = 128
_SUBLANE = 8


def _round_up(n, m):
    return ((n + m - 1) // m) * m


def _dropout_threshold(p):
    # keep iff bits >= threshold  => keep prob ~= 1 - p (quantized to 2**-32).
    return min(int(round(p * (2 ** 32))), 2 ** 32 - 1)


def _random_bits_u32(row, col, seed):
    """Counter-based hash -> uint32 bits.  Pure jnp ops (portable, deterministic)."""
    x = (row * jnp.uint32(0x9E3779B1)) ^ (col * jnp.uint32(0x85EBCA77)) \
        ^ (seed * jnp.uint32(0xC2B2AE3D))
    x = x ^ (x >> 16)
    x = x * jnp.uint32(0x7FEB352D)
    x = x ^ (x >> 15)
    x = x * jnp.uint32(0x846CA68B)
    x = x ^ (x >> 16)
    return x


def _mlp_kernel(seed_ref, x_ref, w1_ref, b1_ref, w2_ref, b2_ref, o_ref, *, p, mxu_dtype):
    x = x_ref[...]
    if mxu_dtype is not None and x.dtype != mxu_dtype:
        x = x.astype(mxu_dtype)           # tiny (tb x D_in) per-step cast; weights arrive pre-cast

    # linear1 + bias + relu (bias add / relu in f32 on the VPU)
    h = jnp.dot(x, w1_ref[...], preferred_element_type=jnp.float32)
    h = jnp.maximum(h + b1_ref[...], 0.0)

    # dropout
    if p >= 1.0:
        # nn.Dropout(p=1) zeroes everything (avoid 1/(1-p) = inf).
        h = jnp.zeros_like(h)
    elif p > 0.0:
        tb = h.shape[0]
        row0 = (pl.program_id(0) * tb).astype(jnp.uint32)   # global row offset of this tile
        row = jax.lax.broadcasted_iota(jnp.uint32, h.shape, 0) + row0
        col = jax.lax.broadcasted_iota(jnp.uint32, h.shape, 1)
        bits = _random_bits_u32(row, col, seed_ref[0].astype(jnp.uint32))
        keep = bits >= jnp.uint32(_dropout_threshold(p))
        # 1/(1-p) rescale is folded into w2 by the wrapper -> only a select here.
        h = jnp.where(keep, h, 0.0)

    if mxu_dtype is not None:
        h = h.astype(mxu_dtype)

    # linear2 + bias (output tile is 128-lane dense -> unmasked stores)
    o = jnp.dot(h, w2_ref[...], preferred_element_type=jnp.float32) + b2_ref[...]
    o_ref[...] = o.astype(o_ref.dtype)


def _choose_tb(B, block_b):
    # Aim for >=4 grid steps (lets the "parallel" batch axis shard across v7x's 2 TCs and
    # keeps the DMA pipeline busy) while capping the tile at block_b rows so double-buffered
    # x/out tiles stay far below the scoped-VMEM defaults on every generation.
    target = _round_up(max(1, -(-B // 4)), _SUBLANE)
    tb = min(_round_up(block_b, _SUBLANE), target)
    return max(tb, _SUBLANE)


def mlp_forward(x, w1, b1, w2, b2, *, p=0.0, seed=0, block_b=1024, mxu_dtype=jnp.bfloat16):
    """x: (B, D_in) f32; w1: (D_in, H); b1: (H,); w2: (H, D_out); b2: (D_out,).

    mxu_dtype: bf16 MXU inputs with f32 accumulation (default, fast on v5e/v6e/v7x);
    pass None for exact f32 matmuls (needed for tight numerical checks).
    """
    B, D_in = x.shape
    D_in_w, H = w1.shape
    H_w, D_out = w2.shape
    assert D_in_w == D_in and H_w == H and b1.shape == (H,) and b2.shape == (D_out,)

    # Lane-pad only the OUTPUT-side feature dims (unmasked stores); x keeps its real lanes.
    h_p = _round_up(H, _LANE)
    d_out_p = _round_up(D_out, _LANE)

    tb = _choose_tb(B, block_b)
    b_p = _round_up(B, tb)
    x_p = x if b_p == B else jnp.pad(x, ((0, b_p - B), (0, 0)))   # cheap: rows only, no lane pad

    w_dtype = x.dtype if mxu_dtype is None else mxu_dtype
    scale = 1.0 / (1.0 - p) if 0.0 < p < 1.0 else 1.0            # dropout rescale folded into w2
    w2_s = w2 * jnp.asarray(scale, w2.dtype) if scale != 1.0 else w2

    # One-time pad + cast of weights/biases (no per-step casts in the kernel).
    w1_p = jnp.pad(w1, ((0, 0), (0, h_p - H))).astype(w_dtype)
    w2_p = jnp.pad(w2_s, ((0, h_p - H), (0, d_out_p - D_out))).astype(w_dtype)
    b1_p = jnp.pad(b1, (0, h_p - H)).reshape(1, h_p).astype(jnp.float32)
    b2_p = jnp.pad(b2, (0, d_out_p - D_out)).reshape(1, d_out_p).astype(jnp.float32)

    seed_arr = jnp.array([seed], dtype=jnp.int32)
    kernel = functools.partial(_mlp_kernel, p=float(p), mxu_dtype=mxu_dtype)

    grid = (b_p // tb,)
    out_p = pl.pallas_call(
        kernel,
        out_shape=jax.ShapeDtypeStruct((b_p, d_out_p), x.dtype),
        grid=grid,
        in_specs=[
            pl.BlockSpec(memory_space=pltpu.SMEM),                 # seed (scalar)
            pl.BlockSpec((tb, D_in), lambda i: (i, 0)),            # x tile (pipelined, real lanes only)
            pl.BlockSpec((D_in, h_p), lambda i: (0, 0)),           # w1 (VMEM-resident)
            pl.BlockSpec((1, h_p), lambda i: (0, 0)),              # b1
            pl.BlockSpec((h_p, d_out_p), lambda i: (0, 0)),        # w2 (VMEM-resident, pre-scaled)
            pl.BlockSpec((1, d_out_p), lambda i: (0, 0)),          # b2
        ],
        out_specs=pl.BlockSpec((tb, d_out_p), lambda i: (i, 0)),
        compiler_params=pltpu.CompilerParams(
            dimension_semantics=("parallel",)),                     # shard batch over both TCs on v7x
    )(seed_arr, x_p, w1_p, b1_p, w2_p, b2_p)

    return out_p[:B, :D_out]


def mlp_reference(x, w1, b1, w2, b2, *, p=0.0, seed=0):
    """Pure-JAX f32 reference, using the same hash-based dropout mask as the kernel."""
    h = jnp.maximum(x @ w1 + b1, 0.0)
    if p >= 1.0:
        h = jnp.zeros_like(h)
    elif p > 0.0:
        B, H = h.shape
        row = jax.lax.broadcasted_iota(jnp.uint32, (B, H), 0)
        col = jax.lax.broadcasted_iota(jnp.uint32, (B, H), 1)
        bits = _random_bits_u32(row, col, jnp.uint32(seed))
        keep = bits >= jnp.uint32(_dropout_threshold(p))
        h = jnp.where(keep, h, 0.0)
        w2 = w2 * jnp.float32(1.0 / (1.0 - p))
    return h @ w2 + b2


if __name__ == "__main__":
    # Net(input_dim=16, hidden_dim1=32, output_dim=8, p=0)
    B, D_IN, H, D_OUT = 20, 16, 32, 8   # B=20 exercises batch padding + a multi-step grid

    key = jax.random.PRNGKey(0)
    kx, k1, kb1, k2, kb2 = jax.random.split(key, 5)

    x = jax.random.normal(kx, (B, D_IN), dtype=jnp.float32)
    # deterministic synthetic init (Kaiming-uniform-like scale)
    w1 = jax.random.uniform(k1, (D_IN, H), jnp.float32, -1.0, 1.0) / jnp.sqrt(D_IN)
    b1 = jax.random.uniform(kb1, (H,), jnp.float32, -1.0, 1.0) / jnp.sqrt(D_IN)
    w2 = jax.random.uniform(k2, (H, D_OUT), jnp.float32, -1.0, 1.0) / jnp.sqrt(H)
    b2 = jax.random.uniform(kb2, (D_OUT,), jnp.float32, -1.0, 1.0) / jnp.sqrt(H)

    # 1) p = 0 (module default), exact f32 path: tight match against the reference.
    out = mlp_forward(x, w1, b1, w2, b2, p=0.0, mxu_dtype=None)
    out = jax.block_until_ready(out)
    ref = mlp_reference(x, w1, b1, w2, b2, p=0.0)
    assert out.shape == (B, D_OUT), out.shape
    assert jnp.allclose(out, ref, atol=1e-5, rtol=1e-5), \
        f"max err {jnp.max(jnp.abs(out - ref))}"

    # 2) default fast path (bf16 MXU inputs, f32 accumulation): loose tolerance.
    out_bf16 = jax.block_until_ready(mlp_forward(x, w1, b1, w2, b2, p=0.0))
    assert jnp.allclose(out_bf16, ref, atol=5e-2, rtol=5e-2), \
        f"max err {jnp.max(jnp.abs(out_bf16 - ref))}"

    # 3) dropout path (p = 0.5), exact f32 path: kernel mask == reference hash mask.
    out_drop = mlp_forward(x, w1, b1, w2, b2, p=0.5, seed=123, mxu_dtype=None)
    out_drop = jax.block_until_ready(out_drop)
    ref_drop = mlp_reference(x, w1, b1, w2, b2, p=0.5, seed=123)
    assert out_drop.shape == (B, D_OUT), out_drop.shape
    assert bool(jnp.all(jnp.isfinite(out_drop)))
    assert jnp.allclose(out_drop, ref_drop, atol=1e-5, rtol=1e-5), \
        f"max err {jnp.max(jnp.abs(out_drop - ref_drop))}"

    print("KERNEL_OK")
</pallas_src>

<mosaic_0001>
module attributes {stable_mosaic.version = 11 : i64} {
  func.func @_mlp_kernel(%arg0: i32, %arg1: memref<1xi32, #tpu.memory_space<smem>>, %arg2: memref<8x16xf32, #tpu.memory_space<vmem>>, %arg3: memref<16x128xf32, #tpu.memory_space<vmem>>, %arg4: memref<1x128xf32, #tpu.memory_space<vmem>>, %arg5: memref<128x128xf32, #tpu.memory_space<vmem>>, %arg6: memref<1x128xf32, #tpu.memory_space<vmem>>, %arg7: memref<8x128xf32, #tpu.memory_space<vmem>>) attributes {dimension_semantics = [#tpu.dimension_semantics<parallel>], iteration_bounds = array<i64: 3>, scalar_prefetch = 0 : i64, scratch_operands = 0 : i64, tpu.core_type = #tpu.core_type<tc>, window_params = [{transform_indices = @transform_0, window_bounds = array<i64: 1>}, {transform_indices = @transform_1, window_bounds = array<i64: 8, 16>}, {pipeline_mode = #tpu.pipeline_mode<synchronous>, transform_indices = @transform_2, window_bounds = array<i64: 16, 128>}, {pipeline_mode = #tpu.pipeline_mode<synchronous>, transform_indices = @transform_3, window_bounds = array<i64: 1, 128>}, {pipeline_mode = #tpu.pipeline_mode<synchronous>, transform_indices = @transform_4, window_bounds = array<i64: 128, 128>}, {pipeline_mode = #tpu.pipeline_mode<synchronous>, transform_indices = @transform_5, window_bounds = array<i64: 1, 128>}, {transform_indices = @transform_6, window_bounds = array<i64: 8, 128>}]} {
    %c0 = arith.constant 0 : index
    %c0_0 = arith.constant 0 : index
    %0 = vector.load %arg2[%c0, %c0_0] : memref<8x16xf32, #tpu.memory_space<vmem>>, vector<8x16xf32>
    %c0_1 = arith.constant 0 : index
    %c0_2 = arith.constant 0 : index
    %1 = vector.load %arg3[%c0_1, %c0_2] : memref<16x128xf32, #tpu.memory_space<vmem>>, vector<16x128xf32>
    %cst = arith.constant dense<0.000000e+00> : vector<8x128xf32>
    %2 = tpu.matmul %0, %1, %cst {dimension_numbers = #tpu.dot_dimension_numbers<[1], [0], [0], [1], [0, 0, 1, 1], [], []>} : vector<8x16xf32>, vector<16x128xf32>, vector<8x128xf32> -> vector<8x128xf32>
    %c0_3 = arith.constant 0 : index
    %c0_4 = arith.constant 0 : index
    %3 = vector.load %arg4[%c0_3, %c0_4] : memref<1x128xf32, #tpu.memory_space<vmem>>, vector<1x128xf32>
    %4 = vector.broadcast %3 : vector<1x128xf32> to vector<8x128xf32>
    %5 = arith.addf %2, %4 : vector<8x128xf32>
    %cst_5 = arith.constant 0.000000e+00 : f32
    %6 = vector.broadcast %cst_5 : f32 to vector<8x128xf32>
    %7 = arith.maximumf %5, %6 : vector<8x128xf32>
    %c0_6 = arith.constant 0 : index
    %c0_7 = arith.constant 0 : index
    %8 = vector.load %arg5[%c0_6, %c0_7] : memref<128x128xf32, #tpu.memory_space<vmem>>, vector<128x128xf32>
    %cst_8 = arith.constant dense<0.000000e+00> : vector<8x128xf32>
    %9 = tpu.matmul %7, %8, %cst_8 {dimension_numbers = #tpu.dot_dimension_numbers<[1], [0], [0], [1], [0, 0, 1, 1], [], []>} : vector<8x128xf32>, vector<128x128xf32>, vector<8x128xf32> -> vector<8x128xf32>
    %c0_9 = arith.constant 0 : index
    %c0_10 = arith.constant 0 : index
    %10 = vector.load %arg6[%c0_9, %c0_10] : memref<1x128xf32, #tpu.memory_space<vmem>>, vector<1x128xf32>
    %11 = vector.broadcast %10 : vector<1x128xf32> to vector<8x128xf32>
    %12 = arith.addf %9, %11 : vector<8x128xf32>
    %c0_11 = arith.constant 0 : index
    %c0_12 = arith.constant 0 : index
    %13 = vector.load %arg7[%c0_11, %c0_12] : memref<8x128xf32, #tpu.memory_space<vmem>>, vector<8x128xf32>
    tpu.vector_store %arg7[%c0_11, %c0_12], %12 {strides = array<i32>} : memref<8x128xf32, #tpu.memory_space<vmem>>, vector<8x128xf32>,
    return
  }
  func.func @transform_0(%arg0: i32) -> i32 {
    %c0_i32 = arith.constant 0 : i32
    %c0_i32_0 = arith.constant 0 : i32
    return %c0_i32 : i32
  }
  func.func @transform_1(%arg0: i32) -> (i32, i32) {
    %c0_i32 = arith.constant 0 : i32
    %c0_i32_0 = arith.constant 0 : i32
    return %arg0, %c0_i32 : i32, i32
  }
  func.func @transform_2(%arg0: i32) -> (i32, i32) {
    %c0_i32 = arith.constant 0 : i32
    %c0_i32_0 = arith.constant 0 : i32
    %c0_i32_1 = arith.constant 0 : i32
    return %c0_i32, %c0_i32_0 : i32, i32
  }
  func.func @transform_3(%arg0: i32) -> (i32, i32) {
    %c0_i32 = arith.constant 0 : i32
    %c0_i32_0 = arith.constant 0 : i32
    %c0_i32_1 = arith.constant 0 : i32
    return %c0_i32, %c0_i32_0 : i32, i32
  }
  func.func @transform_4(%arg0: i32) -> (i32, i32) {
    %c0_i32 = arith.constant 0 : i32
    %c0_i32_0 = arith.constant 0 : i32
    %c0_i32_1 = arith.constant 0 : i32
    return %c0_i32, %c0_i32_0 : i32, i32
  }
  func.func @transform_5(%arg0: i32) -> (i32, i32) {
    %c0_i32 = arith.constant 0 : i32
    %c0_i32_0 = arith.constant 0 : i32
    %c0_i32_1 = arith.constant 0 : i32
    return %c0_i32, %c0_i32_0 : i32, i32
  }
  func.func @transform_6(%arg0: i32) -> (i32, i32) {
    %c0_i32 = arith.constant 0 : i32
    %c0_i32_0 = arith.constant 0 : i32
    return %arg0, %c0_i32 : i32, i32
  }
}

</mosaic_0001>

<bundles_post_ra>
// kernel: tpu_custom_call.1
= control target key start
LH: loop header
LB: loop body
LE: loop exit
PB: predicated region body
PF: predicated region fallthrough
CT: control target
= control target key end

     0   :  { %12 = vsyncpa [#allocation4], 0  ;;  %s971_s0 = inlined_call_operand.<no memory space> [shape: s32[1], index: 0, kind: input, shape index: {}]   ;;  %s972_s1 = inlined_call_operand.vmem [shape: f32[24,16], index: 1, kind: input, shape index: {}]   ;;  %s973_s2 = inlined_call_operand.vmem [shape: f32[16,128], index: 2, kind: input, shape index: {}]   ;;  %s974_s3 = inlined_call_operand.vmem [shape: f32[1,128], index: 3, kind: input, shape index: {}]   ;;  %s975_s4 = inlined_call_operand.hbm [shape: f32[128,128], index: 4, kind: input, shape index: {}]   ;;  %s976_s5 = inlined_call_operand.vmem [shape: f32[1,128], index: 5, kind: input, shape index: {}]   ;;  %s977_s6 = inlined_call_operand.hbm [shape: f32[24,128], index: 6, kind: output, shape index: {}]  }
   0x1   :  { %13 = vsyncpa [#allocation5], 0 }
   0x2   :  { %15 = vsyncpa [#allocation5 + $0x1], 0  ;;  %s824_s0 = smov 0   ;;  %s826_s21 = smov 0  }
   0x3   :  { %s828_s22 = smov 0   ;;  %s830_s23 = smov 0  }
   0x4 LB: > { %s845_s24 = sadd.s32 4294967295, %s780_s23   ;;  %s527_s25 = sadd.s32 4294967294, %s780_s23   ;;  %s780_s23 = sphi %s830_s23, %s993_s23   ;;  %s776_s22 = sphi %s828_s22, %s992_s22   ;;  %s772_s21 = sphi %s826_s21, %s991_s21   ;;  %s768_s0 = sphi %s824_s0, %s990_s0  }
   0x5   : > { %s849_s26 = sadd.s32 1, %s780_s23   ;;  %s159_s27 = sadd.s32 1, %s776_s22 }
   0x6   : > { %s156_s28 = ssub.s32 %s780_s23, %s849_s26  ;;  %p169_p0 = scmp.ne.s32.totalorder %s776_s22, %s772_s21 }
   0x7   : > { %p157_p1 = scmp.eq.s32.totalorder %s156_s28, 0  ;;  %p170_p2 = scmp.eq.s32.totalorder %s845_s24, 2 }
   0x8   : > { %p175_p3 = scmp.ne.s32.totalorder %s772_s21, %s768_s0  ;;  %p176_p4 = scmp.eq.s32.totalorder %s527_s25, 2 }
   0x9   : > { %s860_s29 = scalar_select %p157_p1, %s776_s22, %s159_s27  }
   0xa   : > { %p862_p5 = por %p170_p2, %p169_p0  ;;  %p866_p6 = por %p176_p4, %p175_p3 }
   0xb   : > { %p528_p7 = scmp.ge.s32.totalorder %s780_s23, 1  ;;  %p183_p8 = scmp.lt.s32.totalorder %s780_s23, 4 }
   0xc   : > { %s981_s30 = scalar_select %p862_p5, 1, 0 }
   0xd   : > { %s982_s7 = scalar_select %p866_p6, 1, 0 }
   0xe   : > { %p978_p9 = scmp.eq.s32.totalorder %s845_s24, 0  ;;  %p873_p10 = pnand %p528_p7, %p183_p8 }
   0xf   : > { %s782_s9 = smov [#allocation3]   ;;  %s686_s14 = scalar_lea.hbm %s975_s4, 2048 }
  0x10   : > { %s983_s8 = scalar_select %p873_p10, 1, 0 }
  0x11   : > { %s204_s10 = sshll.u32 %s782_s9, 4  ;;  %p637_p11 = pneg %p873_p10  ;;  %s205_s10 = int_to_ptr.vmem [resolvable:$true] %s204_s10 }
  0x12   : > { %p687_p13 = scmp.ne.s32.totalorder %s975_s4, %s686_s14  ;;  %p693_p3 = scmp.lt.u32.totalorder %s686_s14, %s975_s4 }
  0x13   : > { %p881_p12 = pnand %p978_p9, %p637_p11 }
  0x15   : > { %p688_p0 = pneg %p881_p12 }
  0x17   : > { %p689_p1 = pnand %p688_p0, %p687_p13 }
  0x19   : > { %p690_p2 = pneg %p689_p1 }
  0x1b   : > { %p695_p4 = pnand %p693_p3, %p690_p2 }
  0x1d   : > { %698 = shalt.err (!%p695_p4)
}
  0x1e   : > { %s699_s19 = scalar_lea.vmem %s205_s10, 2048  ;;  %p707_p9 = scmp.lt.s32.totalorder %s205_s10, %s205_s10 }
  0x1f   : > { %p700_p7 = scmp.ne.s32.totalorder %s205_s10, %s699_s19  ;;  %p708_p6 = scmp.lt.s32.totalorder %s699_s19, %s699_s19 }
  0x21   : > { %p702_p8 = pnand %p700_p7, %p688_p0  ;;  %p709_p5 = por %p708_p6, %p707_p9 }
  0x23   : > { %p703_p11 = pneg %p702_p8 }
  0x25   : > { %p710_p10 = pnand %p709_p5, %p703_p11 }
  0x27   : > { %713 = shalt.err (!%p710_p10)
}
  0x28   : > { %s783_s20 = smov 128   ;;  %s784_s25 = smov 8  }
  0x29   : > { %640 = dma.hbm_to_vmem [thread:$0]  (!%p881_p12), %s975_s4, 2048, %s205_s10, [#allocation4], %s783_s20, %s783_s20, %s784_s25  }
  0x2a   : > { %p985_p13 = scmp.ne.s32.totalorder %s983_s8, 0 }
  0x2b   : > { %p986_p1 = scmp.eq.s32.totalorder (!%p985_p13), %s845_s24, 0 }
  0x2c   : > { %230 = sbr.rel (%p985_p13) target bundleno = 503 (0x1f7), region = 44 }
  0x33   : > { %759 = dma.done.wait (%p986_p1), [#allocation4], 2048   ;;  %p987_p0 = pmov %p986_p1 }
  0x34   : > { %p259_p5 = scmp.lt.s32.totalorder %s845_s24, 2  ;;  %v785_v0 = vmov 0.0|0.0   ;;  %vm786_vm0 = vmmov 0   ;;  %v787_v1 = vmov 0.0   ;;  %v264_v2 = vld [vmem:[%s973_s2] sm:$0xff]  ;;  %v265_v3 = vld [vmem:[%s973_s2 + $0x8] sm:$0xff] }
  0x35   : > { %761 = vsyncadd (%p987_p0), [#allocation4], 4294965248  ;;  %604 = vmatprep.subr.bf16.mxu0 %v785_v0  ;;  %566 = vmatprep.mubr.msk.f32.mxu0 %vm786_vm0, %v787_v1  ;;  %v605_v4 = vpack.c.bf16 %v265_v3, %v264_v2  ;;  %v348_v5 = vld [vmem:[#allocation3] sm:$0xff]  ;;  %v349_v6 = vld [vmem:[#allocation3 + $0x8] sm:$0xff]  ;;  %vm273_vm1 = vcmask 130048   ;;  %s256_s19 = sand.u32 1, %s772_s21  }
  0x36   : > { %s260_s9 = scalar_select %p259_p5, %s845_s24, 2  ;;  %607 = vmatprep.subr.bf16.mxu1 %v785_v0  ;;  %601 = vmatprep.mubr.msk.f32.mxu1 %vm786_vm0, %v787_v1  ;;  %v350_v7 = vld [vmem:[#allocation3 + $0x10] sm:$0xff]  ;;  %v608_v8 = vpack.c.bf16 %v349_v6, %v348_v5  ;;  %v351_v9 = vld [vmem:[#allocation3 + $0x18] sm:$0xff]  ;;  %v352_v12 = vld [vmem:[#allocation3 + $0x20] sm:$0xff] }
  0x37   : > { %606 = vmatpush3.bf16.msra.mxu0 %v605_v4  ;;  %v611_v11 = vpack.c.bf16 %v351_v9, %v350_v7  ;;  %v353_v13 = vld [vmem:[#allocation3 + $0x28] sm:$0xff]  ;;  %v354_v15 = vld [vmem:[#allocation3 + $0x30] sm:$0xff]  ;;  %v355_v16 = vld [vmem:[#allocation3 + $0x38] sm:$0xff]  ;;  %s533_s20 = sshll.u32 %s256_s19, 3  ;;  %s539_s28 = sshll.u32 %s845_s24, 7 }
  0x38   : > { %s534_s10 = sshll.u32 %s260_s9, 3  ;;  %609 = vmatpush3.bf16.msra.mxu1 %v608_v8  ;;  %v614_v14 = vpack.c.bf16 %v353_v13, %v352_v12  ;;  %v617_v17 = vpack.c.bf16 %v355_v16, %v354_v15  ;;  %v356_v18 = vld [vmem:[#allocation3 + $0x40] sm:$0xff]  ;;  %v357_v19 = vld [vmem:[#allocation3 + $0x48] sm:$0xff]  ;;  %v358_v21 = vld [vmem:[#allocation3 + $0x50] sm:$0xff]  ;;  %s258_s9 = scalar_lea.vmem [#allocation6], %s533_s20 }
  0x39   : > { %s262_s16 = scalar_lea.vmem %s972_s1, %s534_s10  ;;  %610 = vmatprep.subr.bf16.mxu1 %v785_v0  ;;  %v620_v20 = vpack.c.bf16 %v357_v19, %v356_v18  ;;  %v359_v22 = vld [vmem:[#allocation3 + $0x58] sm:$0xff]  ;;  %v360_v24 = vld [vmem:[#allocation3 + $0x60] sm:$0xff]  ;;  %v361_v25 = vld [vmem:[#allocation3 + $0x68] sm:$0xff]  ;;  %s456_s10 = sshll.u32 %s258_s9, 4  ;;  %s931_s10 = int_to_ptr.vmem [resolvable:$true] %s456_s10 }
  0x3a   : > { %v263_v10 = vld [vmem:[%s262_s16] sm:$0xff]  ;;  %v623_v23 = vpack.c.bf16 %v359_v22, %v358_v21  ;;  %v626_v26 = vpack.c.bf16 %v361_v25, %v360_v24  ;;  %v362_v27 = vld [vmem:[#allocation3 + $0x70] sm:$0xff]  ;;  %v363_v28 = vld [vmem:[#allocation3 + $0x78] sm:$0xff]  ;;  %s929_s12 = scalar_lea.hbm %s977_s6, %s539_s28  ;;  %s443_s13 = scalar_lea.sflag [#allocation5], %s256_s19 }
  0x3b   : > { %567 = vmatmul.mubr.msk.f32.vlgmr.msra.gmra.mrb[0].mxu0 %vm273_vm1, %v263_v10  ;;  %v629_v29 = vpack.c.bf16 %v363_v28, %v362_v27  ;;  %v535_v30 = vld [vmem:[%s974_s3] ss:$0 sm:$0xff]  ;;  %s714_s14 = scalar_lea.vmem %s931_s10, 128  ;;  %p988_p9 = scmp.ne.s32.totalorder %s981_s30, 0 }
  0x3c   : > { %612 = vmatpush3.bf16.msra.mxu1 %v611_v11  ;;  %v537_v35 = vld [vmem:[%s976_s5] ss:$0 sm:$0xff]  ;;  %p715_p6 = scmp.ne.s32.totalorder %s931_s10, %s714_s14  ;;  %s788_s24 = smov [#allocation6]  }
  0x3d   : > { %613 = vmatprep.subr.bf16.mxu1 %v785_v0  ;;  %s718_s15 = sshll.u32 %s788_s24, 4  ;;  %s719_s15 = int_to_ptr.vmem [resolvable:$false] %s718_s15 }
  0x3e   : > { %p716_p10 = pnand %p715_p6, %p988_p9  ;;  %s720_s16 = scalar_lea.vmem %s719_s15, 256 }
  0x3f   : > { %p721_p2 = scmp.lt.s32.totalorder %s931_s10, %s719_s15  ;;  %p722_p3 = scmp.lt.s32.totalorder %s720_s16, %s714_s14 }
  0x40   : > { %615 = vmatpush3.bf16.msra.mxu1 %v614_v14  ;;  %p717_p12 = pneg %p716_p10 }
  0x41   : > { %616 = vmatprep.subr.bf16.mxu1 %v785_v0  ;;  %p723_p4 = por %p722_p3, %p721_p2 }
  0x43   : > { %p724_p7 = pnand %p723_p4, %p717_p12 }
  0x44   : > { %618 = vmatpush3.bf16.msra.mxu1 %v617_v17 }
  0x45   : > { %619 = vmatprep.subr.bf16.mxu1 %v785_v0 }
  0x48   : > { %621 = vmatpush3.bf16.msra.mxu1 %v620_v20 }
  0x49   : > { %622 = vmatprep.subr.bf16.mxu1 %v785_v0 }
  0x4c   : > { %624 = vmatpush3.bf16.msra.mxu1 %v623_v23 }
  0x4d   : > { %625 = vmatprep.subr.bf16.mxu1 %v785_v0 }
  0x50   : > { %627 = vmatpush3.bf16.msra.mxu1 %v626_v26 }
  0x51   : > { %628 = vmatprep.subr.bf16.mxu1 %v785_v0 }
  0x54   : > { %630 = vmatpush3.bf16.msra.mxu1 %v629_v29 }
 0x10e   : > { %v343_v31 = vpop.f32.mrb[0].mxu0 }
 0x10f   : > { %v344_v32 = vadd.f32 %v535_v30, %v343_v31  ;;  %v568_v33 = vpop.f32.mrb[1].mxu0 }
 0x111   : > { %v347_v34 = vmax.f32 %v344_v32, 0.0 }
 0x113   : > { %602 = vmatmul.mubr.f32.vlgmr.msra.gmra.mrb[0].mxu1 %v347_v34 }
 0x1e6   : > { %v437_v36 = vpop.f32.mrb[0].mxu1 }
 0x1e7   : > { %v438_v37 = vadd.f32 %v537_v35, %v437_v36  ;;  %v603_v38 = vpop.f32.mrb[1].mxu1 }
 0x1e9   : > { %441 = vst [vmem:[%s258_s9] sm:$0xff] %v438_v37 }
 0x1ea   : > { %727 = shalt.err (!%p724_p7)
}
 0x1eb   : > { %s728_s17 = scalar_lea.hbm %s929_s12, 128  ;;  %s732_s20 = scalar_lea.hbm %s977_s6, 384 }
 0x1ec   : > { %p729_p8 = scmp.ne.s32.totalorder %s929_s12, %s728_s17  ;;  %p733_p1 = scmp.lt.u32.totalorder %s929_s12, %s977_s6 }
 0x1ed   : > { %p734_p0 = scmp.lt.u32.totalorder %s732_s20, %s728_s17  ;;  %p736_p6 = scmp.lt.u32.totalorder %s728_s17, %s929_s12 }
 0x1ee   : > { %p730_p11 = pnand %p729_p8, %p988_p9 }
 0x1ef   : > { %p735_p5 = por %p734_p0, %p733_p1 }
 0x1f0   : > { %p731_p13 = pneg %p730_p11 }
 0x1f1   : > { %p737_p10 = por %p736_p6, %p735_p5 }
 0x1f3   : > { %p738_p12 = pnand %p737_p10, %p731_p13 }
 0x1f5   : > { %741 = shalt.err (!%p738_p12)
}
 0x1f6   : > { %635 = dma.vmem_to_hbm [thread:$0]  (%p988_p9), %s931_s10, 128, %s929_s12, %s443_s13  }
 0x1f7 PF: > { %p647_p2 = scmp.ge.s32.totalorder %s780_s23, 2  ;;  %s468_s28 = sand.u32 1, %s768_s0  }
 0x1f8   : > { %p989_p3 = scmp.ne.s32.totalorder %s982_s7, 0  ;;  %s469_s9 = scalar_lea.sflag [#allocation5], %s468_s28 }
 0x1fa   : > { %p642_p4 = pnand %p647_p2, %p989_p3 }
 0x1fc   : > { %763 = dma.done.wait (!%p642_p4), %s469_s9, 128  }
 0x1fd   : > { %765 = vsyncadd (!%p642_p4), %s469_s9, 4294967168  ;;  %p18_p7 = scmp.ge.s32.totalorder %s849_s26, 5   ;;  %s990_s0 = smov %s772_s21 }
 0x1fe   : > { %s991_s21 = smov %s776_s22  ;;  %s992_s22 = smov %s860_s29 }
 0x1ff   : > { %s993_s23 = smov %s849_s26  ;;  %20 = sbr.rel (!%p18_p7) target bundleno = 4 (0x4), region = 84 }
 0x206   :  { %474 = vsyncpa [#allocation4], 1 }
 0x207   :  { %476 = vsyncpa [#allocation4 + $0x1], 1 }
 0x208   :  { %477 = vsyncpa [#allocation5], 1 }
 0x209   :  { %479 = vsyncpa [#allocation5 + $0x1], 1 }

</bundles_post_ra>
